<compile_context>
chip_gen: v7x
topology: tpu7x:2x2x1
jax: 0.10.0
libtpu: 0.0.40
codegen_flags: <defaults>
</compile_context>

<pallas_src>
import jax
import jax.numpy as jnp
from jax.experimental import pallas as pl
from jax.experimental.pallas import tpu as pltpu


# ----------------------------------------------------------------------------
# helpers
# ----------------------------------------------------------------------------
def _round_up(x, m):
    return ((x + m - 1) // m) * m


def _vmem_capacity_bytes():
    """Per-core VMEM capacity; conservative 64 MiB fallback (v7x per-TC)."""
    try:
        info = pltpu.get_tpu_info()
        cap = getattr(info, "vmem_capacity_bytes", None)
        if cap:
            # Clamp in case the query reports per-chip instead of per-TC.
            return int(min(int(cap), 128 * 1024 * 1024))
    except Exception:
        pass
    return 64 * 1024 * 1024


def _choose_tm(M, sub=8):
    """Pick a batch tile that divides M (no activation padding when possible)."""
    cap_bytes = _vmem_capacity_bytes()
    # 128 MiB parts (v5e/v6e): bigger tiles amortize per-grid-step overhead.
    # 64 MiB part (v7x, 2 TCs): smaller cap, and prefer >=2 parallel grid steps.
    big_vmem = cap_bytes >= (96 << 20)
    cap = 1024 if big_vmem else 512
    if M <= cap:
        if (not big_vmem) and M >= 256 and M % (2 * sub) == 0:
            return M // 2, M          # two grid steps -> both TensorCores busy
        return M, M                   # single full-extent tile (no (8,128) rule)
    Mp = _round_up(M, sub)
    for tm in range(cap - (cap % sub), sub - 1, -sub):
        if Mp % tm == 0:
            return tm, Mp
    return sub, Mp


# ----------------------------------------------------------------------------
# one-time parameter prep (hoisted out of the hot path per review)
# ----------------------------------------------------------------------------
def prepare_params(W1, W2, Wc1, bc1, Wc2, bc2, Wc3, bc3):
    """Pad weights/biases to lane-dense shapes ONCE; store them persistently."""
    K, F = W1.shape
    Fp = _round_up(F, 128)
    D1, D2, D3 = Wc1.shape[1], Wc2.shape[1], Wc3.shape[1]
    D1p = _round_up(D1, 128)                       # 200 -> 256
    D2p = _round_up(D2, 128)                       # 100 -> 128
    D3p = max(_round_up(D3, 128), 128)             # 2   -> 128

    def pad2(a, rows, cols):
        return jnp.pad(a, ((0, rows - a.shape[0]), (0, cols - a.shape[1])))

    params = {
        "w1": pad2(W1, K, Fp),
        "w2": pad2(W2, K, Fp),
        "wc1": pad2(Wc1, Fp, D1p),
        "bc1": jnp.pad(bc1, (0, D1p - D1)).reshape(1, D1p),
        "wc2": pad2(Wc2, D1p, D2p),
        "bc2": jnp.pad(bc2, (0, D2p - D2)).reshape(1, D2p),
        "wc3": pad2(Wc3, D2p, D3p),
        "bc3": jnp.pad(bc3, (0, D3p - D3)).reshape(1, D3p),
    }
    return params, D3


# ----------------------------------------------------------------------------
# fused kernel: MFB + classifier head in one body (weights VMEM-resident)
# ----------------------------------------------------------------------------
def _fused_kernel(x1_ref, x2_ref, w1_ref, w2_ref,
                  wc1_ref, bc1_ref, wc2_ref, bc2_ref, wc3_ref, bc3_ref,
                  o_ref):
    # --- MFB: both matmuls on the MXU with f32 accumulation, product on VPU ---
    h1 = jnp.dot(x1_ref[...], w1_ref[...], preferred_element_type=jnp.float32)
    h2 = jnp.dot(x2_ref[...], w2_ref[...], preferred_element_type=jnp.float32)
    combined = h1 * h2
    # --- classifier head: Linear -> ReLU -> Linear -> ReLU -> Linear -> Sigmoid
    h = jnp.dot(combined, wc1_ref[...], preferred_element_type=jnp.float32) + bc1_ref[...]
    h = jnp.maximum(h, 0.0)
    h = jnp.dot(h, wc2_ref[...], preferred_element_type=jnp.float32) + bc2_ref[...]
    h = jnp.maximum(h, 0.0)
    h = jnp.dot(h, wc3_ref[...], preferred_element_type=jnp.float32) + bc3_ref[...]
    o_ref[...] = (1.0 / (1.0 + jnp.exp(-h))).astype(o_ref.dtype)


def fused_mfb_classifier(x1, x2, params, num_classes):
    """logits = Sigmoid(MLP((x1 @ W1) * (x2 @ W2))) in a single pallas_call."""
    M, K = x1.shape
    assert x2.shape == (M, K)
    w1, w2 = params["w1"], params["w2"]
    wc1, bc1 = params["wc1"], params["bc1"]
    wc2, bc2 = params["wc2"], params["bc2"]
    wc3, bc3 = params["wc3"], params["bc3"]
    assert w1.shape[0] == K
    Fp = w1.shape[1]
    D1p, D2p, D3p = wc1.shape[1], wc2.shape[1], wc3.shape[1]

    tm, Mp = _choose_tm(M)
    if Mp != M:
        # TODO(synk): the ragged last tile could be handled with an in-kernel
        # mask instead of padding; at the spec's shapes no padding ever occurs.
        x1 = jnp.pad(x1, ((0, Mp - M), (0, 0)))
        x2 = jnp.pad(x2, ((0, Mp - M), (0, 0)))
    grid_m = Mp // tm

    # --- VMEM budget: weights counted once-resident, activations double-buffered
    f32 = 4
    weight_bytes = (2 * K * Fp + Fp * D1p + D1p * D2p + D2p * D3p
                    + D1p + D2p + D3p) * f32
    act_bytes = (2 * 2 * tm * K + 2 * tm * D3p) * f32
    vmem_limit = int(min(48 << 20,                     # v7x headroom cap
                         max(2 * weight_bytes + act_bytes + (4 << 20),
                             16 << 20)))

    out = pl.pallas_call(
        _fused_kernel,
        out_shape=jax.ShapeDtypeStruct((Mp, D3p), x1.dtype),
        grid_spec=pltpu.PrefetchScalarGridSpec(
            num_scalar_prefetch=0,
            grid=(grid_m,),
            in_specs=[
                pl.BlockSpec((tm, K), lambda i: (i, 0)),      # conv features tile
                pl.BlockSpec((tm, K), lambda i: (i, 0)),      # mlp  features tile
                pl.BlockSpec((K, Fp), lambda i: (0, 0)),      # W1 (VMEM-resident)
                pl.BlockSpec((K, Fp), lambda i: (0, 0)),      # W2 (VMEM-resident)
                pl.BlockSpec((Fp, D1p), lambda i: (0, 0)),    # Wc1 (pre-padded)
                pl.BlockSpec((1, D1p), lambda i: (0, 0)),     # bc1
                pl.BlockSpec((D1p, D2p), lambda i: (0, 0)),   # Wc2
                pl.BlockSpec((1, D2p), lambda i: (0, 0)),     # bc2
                pl.BlockSpec((D2p, D3p), lambda i: (0, 0)),   # Wc3 (lane-padded)
                pl.BlockSpec((1, D3p), lambda i: (0, 0)),     # bc3
            ],
            out_specs=pl.BlockSpec((tm, D3p), lambda i: (i, 0)),
        ),
        compiler_params=pltpu.CompilerParams(
            dimension_semantics=("parallel",),
            vmem_limit_bytes=vmem_limit),
    )(x1, x2, w1, w2, wc1, bc1, wc2, bc2, wc3, bc3)

    if Mp != M or D3p != num_classes:
        out = out[:M, :num_classes]
    return out


def combined_model_forward(conv_features, mlp_features, params, num_classes):
    """Mirrors CombinedModel.forward starting from the backbone features."""
    # TODO(synk): conv_model / mlp_extractor backbones are external modules not
    # defined in the spec; forward starts from their 128-d feature outputs.
    logits = fused_mfb_classifier(conv_features, mlp_features, params, num_classes)
    return logits, conv_features, mlp_features


# ----------------------------------------------------------------------------
# demo / correctness check
# ----------------------------------------------------------------------------
if __name__ == "__main__":
    # Shapes consistent with CombinedModel: MFB(128, 128), head 128->200->100->2.
    B = 8
    feat_dim = 128     # conv_features / mlp_features width (fixed by the module)
    factor_dim = 128

    key = jax.random.PRNGKey(0)
    keys = jax.random.split(key, 10)

    # Feature-extractor outputs (backbones are external; see TODO above).
    conv_features = jax.random.normal(keys[0], (B, feat_dim), dtype=jnp.float32)
    mlp_features = jax.random.normal(keys[1], (B, feat_dim), dtype=jnp.float32)

    # MFB parameters (torch.randn init).
    W1 = jax.random.normal(keys[2], (feat_dim, factor_dim), dtype=jnp.float32)
    W2 = jax.random.normal(keys[3], (feat_dim, factor_dim), dtype=jnp.float32)

    # Classifier parameters (nn.Linear default uniform(+-1/sqrt(fan_in)) init).
    def linear_init(kw, kb, fan_in, fan_out):
        bound = 1.0 / (fan_in ** 0.5)
        W = jax.random.uniform(kw, (fan_in, fan_out), jnp.float32, -bound, bound)
        b = jax.random.uniform(kb, (fan_out,), jnp.float32, -bound, bound)
        return W, b

    Wc1, bc1 = linear_init(keys[4], keys[5], factor_dim, 200)
    Wc2, bc2 = linear_init(keys[6], keys[7], 200, 100)
    Wc3, bc3 = linear_init(keys[8], keys[9], 100, 2)

    # One-time parameter prep (pads / reshapes hoisted out of the hot path).
    params, num_classes = prepare_params(W1, W2, Wc1, bc1, Wc2, bc2, Wc3, bc3)
    params = jax.tree_util.tree_map(jax.block_until_ready, params)

    # --- fused forward pass (single pallas_call) -----------------------------
    logits, conv_out, mlp_out = combined_model_forward(
        conv_features, mlp_features, params, num_classes)
    logits = jax.block_until_ready(logits)

    # --- pure-JAX reference (PyTorch-parity f32 numerics) --------------------
    ref_combined = (conv_features @ W1) * (mlp_features @ W2)
    h = jnp.maximum(ref_combined @ Wc1 + bc1, 0.0)
    h = jnp.maximum(h @ Wc2 + bc2, 0.0)
    ref_logits = 1.0 / (1.0 + jnp.exp(-(h @ Wc3 + bc3)))

    assert logits.shape == (B, 2)
    assert jnp.allclose(logits, ref_logits, rtol=1e-4, atol=1e-4)
    assert conv_out.shape == (B, feat_dim) and mlp_out.shape == (B, feat_dim)
    assert jnp.array_equal(conv_out, conv_features)
    assert jnp.array_equal(mlp_out, mlp_features)

    print("KERNEL_OK")
</pallas_src>

<mosaic_0001>
module attributes {stable_mosaic.version = 11 : i64} {
  func.func @_fused_kernel(%arg0: i32, %arg1: memref<8x128xf32, #tpu.memory_space<vmem>>, %arg2: memref<8x128xf32, #tpu.memory_space<vmem>>, %arg3: memref<128x128xf32, #tpu.memory_space<vmem>>, %arg4: memref<128x128xf32, #tpu.memory_space<vmem>>, %arg5: memref<128x256xf32, #tpu.memory_space<vmem>>, %arg6: memref<1x256xf32, #tpu.memory_space<vmem>>, %arg7: memref<256x128xf32, #tpu.memory_space<vmem>>, %arg8: memref<1x128xf32, #tpu.memory_space<vmem>>, %arg9: memref<128x128xf32, #tpu.memory_space<vmem>>, %arg10: memref<1x128xf32, #tpu.memory_space<vmem>>, %arg11: memref<8x128xf32, #tpu.memory_space<vmem>>) attributes {dimension_semantics = [#tpu.dimension_semantics<parallel>], iteration_bounds = array<i64: 1>, scalar_prefetch = 0 : i64, scratch_operands = 0 : i64, tpu.core_type = #tpu.core_type<tc>, window_params = [{transform_indices = @transform_0, window_bounds = array<i64: 8, 128>}, {transform_indices = @transform_1, window_bounds = array<i64: 8, 128>}, {pipeline_mode = #tpu.pipeline_mode<synchronous>, transform_indices = @transform_2, window_bounds = array<i64: 128, 128>}, {pipeline_mode = #tpu.pipeline_mode<synchronous>, transform_indices = @transform_3, window_bounds = array<i64: 128, 128>}, {pipeline_mode = #tpu.pipeline_mode<synchronous>, transform_indices = @transform_4, window_bounds = array<i64: 128, 256>}, {pipeline_mode = #tpu.pipeline_mode<synchronous>, transform_indices = @transform_5, window_bounds = array<i64: 1, 256>}, {pipeline_mode = #tpu.pipeline_mode<synchronous>, transform_indices = @transform_6, window_bounds = array<i64: 256, 128>}, {pipeline_mode = #tpu.pipeline_mode<synchronous>, transform_indices = @transform_7, window_bounds = array<i64: 1, 128>}, {pipeline_mode = #tpu.pipeline_mode<synchronous>, transform_indices = @transform_8, window_bounds = array<i64: 128, 128>}, {pipeline_mode = #tpu.pipeline_mode<synchronous>, transform_indices = @transform_9, window_bounds = array<i64: 1, 128>}, {transform_indices = @transform_10, window_bounds = array<i64: 8, 128>}]} {
    %c0 = arith.constant 0 : index
    %c0_0 = arith.constant 0 : index
    %0 = vector.load %arg1[%c0, %c0_0] : memref<8x128xf32, #tpu.memory_space<vmem>>, vector<8x128xf32>
    %c0_1 = arith.constant 0 : index
    %c0_2 = arith.constant 0 : index
    %1 = vector.load %arg3[%c0_1, %c0_2] : memref<128x128xf32, #tpu.memory_space<vmem>>, vector<128x128xf32>
    %cst = arith.constant dense<0.000000e+00> : vector<8x128xf32>
    %2 = tpu.matmul %0, %1, %cst {dimension_numbers = #tpu.dot_dimension_numbers<[1], [0], [0], [1], [0, 0, 1, 1], [], []>} : vector<8x128xf32>, vector<128x128xf32>, vector<8x128xf32> -> vector<8x128xf32>
    %c0_3 = arith.constant 0 : index
    %c0_4 = arith.constant 0 : index
    %3 = vector.load %arg2[%c0_3, %c0_4] : memref<8x128xf32, #tpu.memory_space<vmem>>, vector<8x128xf32>
    %c0_5 = arith.constant 0 : index
    %c0_6 = arith.constant 0 : index
    %4 = vector.load %arg4[%c0_5, %c0_6] : memref<128x128xf32, #tpu.memory_space<vmem>>, vector<128x128xf32>
    %cst_7 = arith.constant dense<0.000000e+00> : vector<8x128xf32>
    %5 = tpu.matmul %3, %4, %cst_7 {dimension_numbers = #tpu.dot_dimension_numbers<[1], [0], [0], [1], [0, 0, 1, 1], [], []>} : vector<8x128xf32>, vector<128x128xf32>, vector<8x128xf32> -> vector<8x128xf32>
    %6 = arith.mulf %2, %5 : vector<8x128xf32>
    %c0_8 = arith.constant 0 : index
    %c0_9 = arith.constant 0 : index
    %7 = vector.load %arg5[%c0_8, %c0_9] : memref<128x256xf32, #tpu.memory_space<vmem>>, vector<128x256xf32>
    %cst_10 = arith.constant dense<0.000000e+00> : vector<8x256xf32>
    %8 = tpu.matmul %6, %7, %cst_10 {dimension_numbers = #tpu.dot_dimension_numbers<[1], [0], [0], [1], [0, 0, 1, 1], [], []>} : vector<8x128xf32>, vector<128x256xf32>, vector<8x256xf32> -> vector<8x256xf32>
    %c0_11 = arith.constant 0 : index
    %c0_12 = arith.constant 0 : index
    %9 = vector.load %arg6[%c0_11, %c0_12] : memref<1x256xf32, #tpu.memory_space<vmem>>, vector<1x256xf32>
    %10 = vector.broadcast %9 : vector<1x256xf32> to vector<8x256xf32>
    %11 = arith.addf %8, %10 : vector<8x256xf32>
    %cst_13 = arith.constant 0.000000e+00 : f32
    %12 = vector.broadcast %cst_13 : f32 to vector<8x256xf32>
    %13 = arith.maximumf %11, %12 : vector<8x256xf32>
    %c0_14 = arith.constant 0 : index
    %c0_15 = arith.constant 0 : index
    %14 = vector.load %arg7[%c0_14, %c0_15] : memref<256x128xf32, #tpu.memory_space<vmem>>, vector<256x128xf32>
    %cst_16 = arith.constant dense<0.000000e+00> : vector<8x128xf32>
    %15 = tpu.matmul %13, %14, %cst_16 {dimension_numbers = #tpu.dot_dimension_numbers<[1], [0], [0], [1], [0, 0, 1, 1], [], []>} : vector<8x256xf32>, vector<256x128xf32>, vector<8x128xf32> -> vector<8x128xf32>
    %c0_17 = arith.constant 0 : index
    %c0_18 = arith.constant 0 : index
    %16 = vector.load %arg8[%c0_17, %c0_18] : memref<1x128xf32, #tpu.memory_space<vmem>>, vector<1x128xf32>
    %17 = vector.broadcast %16 : vector<1x128xf32> to vector<8x128xf32>
    %18 = arith.addf %15, %17 : vector<8x128xf32>
    %cst_19 = arith.constant 0.000000e+00 : f32
    %19 = vector.broadcast %cst_19 : f32 to vector<8x128xf32>
    %20 = arith.maximumf %18, %19 : vector<8x128xf32>
    %c0_20 = arith.constant 0 : index
    %c0_21 = arith.constant 0 : index
    %21 = vector.load %arg9[%c0_20, %c0_21] : memref<128x128xf32, #tpu.memory_space<vmem>>, vector<128x128xf32>
    %cst_22 = arith.constant dense<0.000000e+00> : vector<8x128xf32>
    %22 = tpu.matmul %20, %21, %cst_22 {dimension_numbers = #tpu.dot_dimension_numbers<[1], [0], [0], [1], [0, 0, 1, 1], [], []>} : vector<8x128xf32>, vector<128x128xf32>, vector<8x128xf32> -> vector<8x128xf32>
    %c0_23 = arith.constant 0 : index
    %c0_24 = arith.constant 0 : index
    %23 = vector.load %arg10[%c0_23, %c0_24] : memref<1x128xf32, #tpu.memory_space<vmem>>, vector<1x128xf32>
    %24 = vector.broadcast %23 : vector<1x128xf32> to vector<8x128xf32>
    %25 = arith.addf %22, %24 : vector<8x128xf32>
    %cst_25 = arith.constant 0.000000e+00 : f32
    %26 = vector.broadcast %cst_25 : f32 to vector<8x128xf32>
    %27 = arith.subf %26, %25 : vector<8x128xf32>
    %28 = math.exp %27 : vector<8x128xf32>
    %cst_26 = arith.constant 1.000000e+00 : f32
    %29 = vector.broadcast %cst_26 : f32 to vector<8x128xf32>
    %30 = arith.addf %29, %28 : vector<8x128xf32>
    %cst_27 = arith.constant 1.000000e+00 : f32
    %31 = vector.broadcast %cst_27 : f32 to vector<8x128xf32>
    %32 = arith.divf %31, %30 : vector<8x128xf32>
    %c0_28 = arith.constant 0 : index
    %c0_29 = arith.constant 0 : index
    %33 = vector.load %arg11[%c0_28, %c0_29] : memref<8x128xf32, #tpu.memory_space<vmem>>, vector<8x128xf32>
    tpu.vector_store %arg11[%c0_28, %c0_29], %32 {strides = array<i32>} : memref<8x128xf32, #tpu.memory_space<vmem>>, vector<8x128xf32>,
    return
  }
  func.func @transform_0(%arg0: i32) -> (i32, i32) {
    %c0_i32 = arith.constant 0 : i32
    %c0_i32_0 = arith.constant 0 : i32
    return %arg0, %c0_i32 : i32, i32
  }
  func.func @transform_1(%arg0: i32) -> (i32, i32) {
    %c0_i32 = arith.constant 0 : i32
    %c0_i32_0 = arith.constant 0 : i32
    return %arg0, %c0_i32 : i32, i32
  }
  func.func @transform_2(%arg0: i32) -> (i32, i32) {
    %c0_i32 = arith.constant 0 : i32
    %c0_i32_0 = arith.constant 0 : i32
    %c0_i32_1 = arith.constant 0 : i32
    return %c0_i32, %c0_i32_0 : i32, i32
  }
  func.func @transform_3(%arg0: i32) -> (i32, i32) {
    %c0_i32 = arith.constant 0 : i32
    %c0_i32_0 = arith.constant 0 : i32
    %c0_i32_1 = arith.constant 0 : i32
    return %c0_i32, %c0_i32_0 : i32, i32
  }
  func.func @transform_4(%arg0: i32) -> (i32, i32) {
    %c0_i32 = arith.constant 0 : i32
    %c0_i32_0 = arith.constant 0 : i32
    %c0_i32_1 = arith.constant 0 : i32
    return %c0_i32, %c0_i32_0 : i32, i32
  }
  func.func @transform_5(%arg0: i32) -> (i32, i32) {
    %c0_i32 = arith.constant 0 : i32
    %c0_i32_0 = arith.constant 0 : i32
    %c0_i32_1 = arith.constant 0 : i32
    return %c0_i32, %c0_i32_0 : i32, i32
  }
  func.func @transform_6(%arg0: i32) -> (i32, i32) {
    %c0_i32 = arith.constant 0 : i32
    %c0_i32_0 = arith.constant 0 : i32
    %c0_i32_1 = arith.constant 0 : i32
    return %c0_i32, %c0_i32_0 : i32, i32
  }
  func.func @transform_7(%arg0: i32) -> (i32, i32) {
    %c0_i32 = arith.constant 0 : i32
    %c0_i32_0 = arith.constant 0 : i32
    %c0_i32_1 = arith.constant 0 : i32
    return %c0_i32, %c0_i32_0 : i32, i32
  }
  func.func @transform_8(%arg0: i32) -> (i32, i32) {
    %c0_i32 = arith.constant 0 : i32
    %c0_i32_0 = arith.constant 0 : i32
    %c0_i32_1 = arith.constant 0 : i32
    return %c0_i32, %c0_i32_0 : i32, i32
  }
  func.func @transform_9(%arg0: i32) -> (i32, i32) {
    %c0_i32 = arith.constant 0 : i32
    %c0_i32_0 = arith.constant 0 : i32
    %c0_i32_1 = arith.constant 0 : i32
    return %c0_i32, %c0_i32_0 : i32, i32
  }
  func.func @transform_10(%arg0: i32) -> (i32, i32) {
    %c0_i32 = arith.constant 0 : i32
    %c0_i32_0 = arith.constant 0 : i32
    return %arg0, %c0_i32 : i32, i32
  }
}

</mosaic_0001>

<bundles_post_ra>
// kernel: tpu_custom_call.1
= control target key start
LH: loop header
LB: loop body
LE: loop exit
PB: predicated region body
PF: predicated region fallthrough
CT: control target
= control target key end

     0   :  { %15 = vsyncpa [#allocation3], 0  ;;  %s1399_s0 = inlined_call_operand.hbm [shape: f32[8,128], index: 0, kind: input, shape index: {}]   ;;  %s1400_s1 = inlined_call_operand.hbm [shape: f32[8,128], index: 1, kind: input, shape index: {}]   ;;  %s1401_s2 = inlined_call_operand.hbm [shape: f32[128,128], index: 2, kind: input, shape index: {}]   ;;  %s1402_s3 = inlined_call_operand.hbm [shape: f32[128,128], index: 3, kind: input, shape index: {}]   ;;  %s1403_s4 = inlined_call_operand.hbm [shape: f32[128,256], index: 4, kind: input, shape index: {}]   ;;  %s1404_s5 = inlined_call_operand.vmem [shape: f32[1,256], index: 5, kind: input, shape index: {}]   ;;  %s1405_s6 = inlined_call_operand.hbm [shape: f32[256,128], index: 6, kind: input, shape index: {}]   ;;  %s1406_s7 = inlined_call_operand.vmem [shape: f32[1,128], index: 7, kind: input, shape index: {}]   ;;  %s1407_s8 = inlined_call_operand.hbm [shape: f32[128,128], index: 8, kind: input, shape index: {}]   ;;  %s1408_s9 = inlined_call_operand.vmem [shape: f32[1,128], index: 9, kind: input, shape index: {}]   ;;  %s1409_s10 = inlined_call_operand.hbm [shape: f32[8,128], index: 10, kind: output, shape index: {}]  }
   0x1   :  { %16 = vsyncpa [#allocation6], 0 }
   0x2   :  { %17 = vsyncpa [#allocation9], 0 }
   0x3   :  { %18 = vsyncpa [#allocation12], 0 }
   0x4   :  { %19 = vsyncpa [#allocation4], 0  ;;  %s1181_s13 = smov [#allocation5]   ;;  %s995_s17 = scalar_lea.hbm %s1400_s1, 128 }
   0x5   :  { %s36_s14 = sshll.u32 %s1181_s13, 4  ;;  %p996_p0 = scmp.ne.s32.totalorder %s1400_s1, %s995_s17  ;;  %s37_s14 = int_to_ptr.vmem [resolvable:$true] %s36_s14 }
   0x6   :  { %p999_p1 = scmp.lt.u32.totalorder %s995_s17, %s1400_s1 }
   0x8   :  { %p1001_p2 = pnand %p999_p1, %p996_p0 }
   0xa   :  { %1004 = shalt.err (!%p1001_p2)
}
   0xb   :  { %s1005_s22 = scalar_lea.vmem %s37_s14, 128  ;;  %p1010_p4 = scmp.lt.s32.totalorder %s37_s14, %s37_s14 }
   0xc   :  { %p1006_p3 = scmp.ne.s32.totalorder %s37_s14, %s1005_s22  ;;  %p1011_p5 = scmp.lt.s32.totalorder %s1005_s22, %s1005_s22 }
   0xe   :  { %p1012_p6 = por %p1011_p5, %p1010_p4 }
  0x10   :  { %p1013_p7 = pnand %p1012_p6, %p1006_p3 }
  0x12   :  { %1016 = shalt.err (!%p1013_p7)
}
  0x13   :  { %39 = dma.hbm_to_vmem [thread:$0]  %s1400_s1, 128, %s37_s14, [#allocation6]  }
  0x14   :  { %s1182_s25 = smov [#allocation8]   ;;  %s1183_s27 = smov [#allocation11]  }
  0x15   :  { %s57_s26 = sshll.u32 %s1182_s25, 4  ;;  %s83_s28 = sshll.u32 %s1183_s27, 4  ;;  %s58_s26 = int_to_ptr.vmem [resolvable:$true] %s57_s26  ;;  %s84_s28 = int_to_ptr.vmem [resolvable:$true] %s83_s28 }
  0x16   :  { %s1017_s11 = scalar_lea.hbm %s1402_s3, 2048 }
  0x17   :  { %p1018_p8 = scmp.ne.s32.totalorder %s1402_s3, %s1017_s11  ;;  %p1021_p9 = scmp.lt.u32.totalorder %s1017_s11, %s1402_s3 }
  0x19   :  { %p1023_p10 = pnand %p1021_p9, %p1018_p8 }
  0x1b   :  { %1026 = shalt.err (!%p1023_p10)
}
  0x1c   :  { %s1027_s1 = scalar_lea.vmem %s58_s26, 2048  ;;  %p1032_p12 = scmp.lt.s32.totalorder %s58_s26, %s58_s26 }
  0x1d   :  { %p1028_p11 = scmp.ne.s32.totalorder %s58_s26, %s1027_s1  ;;  %p1033_p13 = scmp.lt.s32.totalorder %s1027_s1, %s1027_s1 }
  0x1f   :  { %p1034_p0 = por %p1033_p13, %p1032_p12 }
  0x21   :  { %p1035_p1 = pnand %p1034_p0, %p1028_p11 }
  0x23   :  { %1038 = shalt.err (!%p1035_p1)
}
  0x24   :  { %s1184_s14 = smov 128   ;;  %s1185_s17 = smov 8  }
  0x25   :  { %63 = dma.hbm_to_vmem [thread:$0]  %s1402_s3, 2048, %s58_s26, [#allocation9], %s1184_s14, %s1184_s14, %s1185_s17  }
  0x26   :  { %s1039_s22 = scalar_lea.hbm %s1405_s6, 4096 }
  0x27   :  { %p1040_p2 = scmp.ne.s32.totalorder %s1405_s6, %s1039_s22  ;;  %p1043_p3 = scmp.lt.u32.totalorder %s1039_s22, %s1405_s6 }
  0x29   :  { %p1045_p4 = pnand %p1043_p3, %p1040_p2 }
  0x2b   :  { %1048 = shalt.err (!%p1045_p4)
}
  0x2c   :  { %s1049_s29 = scalar_lea.vmem %s84_s28, 4096  ;;  %p1054_p6 = scmp.lt.s32.totalorder %s84_s28, %s84_s28 }
  0x2d   :  { %p1050_p5 = scmp.ne.s32.totalorder %s84_s28, %s1049_s29  ;;  %p1055_p7 = scmp.lt.s32.totalorder %s1049_s29, %s1049_s29 }
  0x2f   :  { %p1056_p8 = por %p1055_p7, %p1054_p6 }
  0x31   :  { %p1057_p9 = pnand %p1056_p8, %p1050_p5 }
  0x33   :  { %1060 = shalt.err (!%p1057_p9)
}
  0x34   :  { %89 = dma.hbm_to_vmem [thread:$0]  %s1405_s6, 4096, %s84_s28, [#allocation12], %s1184_s14, %s1184_s14, %s1185_s17  }
  0x35   :  { %s1186_s30 = smov [#allocation2]   ;;  %s1187_s12 = smov [#allocation7]  }
  0x36   :  { %s26_s11 = sshll.u32 %s1186_s30, 4  ;;  %s45_s13 = sshll.u32 %s1187_s12, 4  ;;  %s27_s11 = int_to_ptr.vmem [resolvable:$true] %s26_s11  ;;  %s46_s13 = int_to_ptr.vmem [resolvable:$true] %s45_s13 }
  0x37   :  { %s1061_s1 = scalar_lea.hbm %s1399_s0, 128 }
  0x38   :  { %p1062_p10 = scmp.ne.s32.totalorder %s1399_s0, %s1061_s1  ;;  %p1065_p11 = scmp.lt.u32.totalorder %s1061_s1, %s1399_s0 }
  0x3a   :  { %p1067_p12 = pnand %p1065_p11, %p1062_p10 }
  0x3c   :  { %1070 = shalt.err (!%p1067_p12)
}
  0x3d   :  { %s1071_s6 = scalar_lea.vmem %s27_s11, 128  ;;  %p1076_p0 = scmp.lt.s32.totalorder %s27_s11, %s27_s11 }
  0x3e   :  { %p1072_p13 = scmp.ne.s32.totalorder %s27_s11, %s1071_s6  ;;  %p1077_p1 = scmp.lt.s32.totalorder %s1071_s6, %s1071_s6 }
  0x40   :  { %p1078_p2 = por %p1077_p1, %p1076_p0 }
  0x42   :  { %p1079_p3 = pnand %p1078_p2, %p1072_p13 }
  0x44   :  { %1082 = shalt.err (!%p1079_p3)
}
  0x45   :  { %29 = dma.hbm_to_vmem [thread:$0]  %s1399_s0, 128, %s27_s11, [#allocation3]  }
  0x46   :  { %s1083_s25 = scalar_lea.hbm %s1401_s2, 2048 }
  0x47   :  { %p1084_p4 = scmp.ne.s32.totalorder %s1401_s2, %s1083_s25  ;;  %p1087_p5 = scmp.lt.u32.totalorder %s1083_s25, %s1401_s2 }
  0x49   :  { %p1089_p6 = pnand %p1087_p5, %p1084_p4 }
  0x4b   :  { %1092 = shalt.err (!%p1089_p6)
}
  0x4c   :  { %s1093_s30 = scalar_lea.vmem %s46_s13, 2048  ;;  %p1098_p8 = scmp.lt.s32.totalorder %s46_s13, %s46_s13 }
  0x4d   :  { %p1094_p7 = scmp.ne.s32.totalorder %s46_s13, %s1093_s30  ;;  %p1099_p9 = scmp.lt.s32.totalorder %s1093_s30, %s1093_s30 }
  0x4f   :  { %p1100_p10 = por %p1099_p9, %p1098_p8 }
  0x51   :  { %p1101_p11 = pnand %p1100_p10, %p1094_p7 }
  0x53   :  { %1104 = shalt.err (!%p1101_p11)
}
  0x54   :  { %51 = dma.hbm_to_vmem [thread:$0]  %s1401_s2, 2048, %s46_s13, [#allocation6], %s1184_s14, %s1184_s14, %s1185_s17  }
  0x55   :  { %s1188_s12 = smov [#allocation10]   ;;  %s1105_s18 = scalar_lea.hbm %s1403_s4, 4096 }
  0x56   :  { %s69_s15 = sshll.u32 %s1188_s12, 4  ;;  %p1106_p12 = scmp.ne.s32.totalorder %s1403_s4, %s1105_s18  ;;  %s70_s15 = int_to_ptr.vmem [resolvable:$true] %s69_s15 }
  0x57   :  { %p1109_p13 = scmp.lt.u32.totalorder %s1105_s18, %s1403_s4 }
  0x59   :  { %p1111_p0 = pnand %p1109_p13, %p1106_p12 }
  0x5b   :  { %1114 = shalt.err (!%p1111_p0)
}
  0x5c   :  { %s1115_s28 = scalar_lea.vmem %s70_s15, 4096  ;;  %p1120_p2 = scmp.lt.s32.totalorder %s70_s15, %s70_s15 }
  0x5d   :  { %p1116_p1 = scmp.ne.s32.totalorder %s70_s15, %s1115_s28  ;;  %p1121_p3 = scmp.lt.s32.totalorder %s1115_s28, %s1115_s28 }
  0x5f   :  { %p1122_p4 = por %p1121_p3, %p1120_p2 }
  0x61   :  { %p1123_p5 = pnand %p1122_p4, %p1116_p1 }
  0x63   :  { %1126 = shalt.err (!%p1123_p5)
}
  0x64   :  { %s1189_s2 = smov 256   ;;  %s1190_s13 = smov 16  }
  0x65   :  { %75 = dma.hbm_to_vmem [thread:$0]  %s1403_s4, 4096, %s70_s15, [#allocation9], %s1189_s2, %s1189_s2, %s1190_s13  }
  0x66   :  { %s1191_s24 = smov [#allocation13]   ;;  %s1127_s3 = scalar_lea.hbm %s1407_s8, 2048 }
  0x67   :  { %s97_s25 = sshll.u32 %s1191_s24, 4  ;;  %p1128_p6 = scmp.ne.s32.totalorder %s1407_s8, %s1127_s3  ;;  %s98_s25 = int_to_ptr.vmem [resolvable:$true] %s97_s25 }
  0x68   :  { %p1131_p7 = scmp.lt.u32.totalorder %s1127_s3, %s1407_s8 }
  0x6a   :  { %p1133_p8 = pnand %p1131_p7, %p1128_p6 }
  0x6c   :  { %1136 = shalt.err (!%p1133_p8)
}
  0x6d   :  { %s1137_s12 = scalar_lea.vmem %s98_s25, 2048  ;;  %p1142_p10 = scmp.lt.s32.totalorder %s98_s25, %s98_s25 }
  0x6e   :  { %p1138_p9 = scmp.ne.s32.totalorder %s98_s25, %s1137_s12  ;;  %p1143_p11 = scmp.lt.s32.totalorder %s1137_s12, %s1137_s12 }
  0x70   :  { %p1144_p12 = por %p1143_p11, %p1142_p10 }
  0x72   :  { %p1145_p13 = pnand %p1144_p12, %p1138_p9 }
  0x74   :  { %1148 = shalt.err (!%p1145_p13)
}
  0x75   :  { %103 = dma.hbm_to_vmem [thread:$0]  %s1407_s8, 2048, %s98_s25, [#allocation12], %s1184_s14, %s1184_s14, %s1185_s17  }
  0x76   :  { %1171 = dma.done.wait [#allocation3], 128  }
  0x77   :  { %1172 = vsyncadd [#allocation3], 4294967168 }
  0x78   :  { %1173 = dma.done.wait [#allocation6], 2176  }
  0x79   :  { %1174 = vsyncadd [#allocation6], 4294965120 }
  0x7a   :  { %1175 = dma.done.wait [#allocation9], 6144  }
  0x7b   :  { %1176 = vsyncadd [#allocation9], 4294961152 }
  0x7c   :  { %1177 = dma.done.wait [#allocation12], 6144  }
  0x7d   :  { %1178 = vsyncadd [#allocation12], 4294961152  ;;  %v1192_v0 = vmov 0.0|0.0   ;;  %vm1193_vm0 = vmmov 0   ;;  %v1194_v1 = vmov 0.0   ;;  %v128_v2 = vld [vmem:[#allocation7] sm:$0xff] }
  0x7e   :  { %840 = vmatprep.subr.bf16.mxu0 %v1192_v0  ;;  %864 = vmatprep.subr.bf16.mxu1 %v1192_v0  ;;  %v129_v3 = vld [vmem:[#allocation7 + $0x8] sm:$0xff]  ;;  %v215_v4 = vld [vmem:[#allocation8] sm:$0xff]  ;;  %v130_v7 = vld [vmem:[#allocation7 + $0x10] sm:$0xff]  ;;  %s1195_s18 = smov [#allocation14]  }
  0x7f   :  { %767 = vmatprep.mubr.msk.f32.mxu0 %vm1193_vm0, %v1194_v1  ;;  %802 = vmatprep.mubr.msk.f32.mxu1 %vm1193_vm0, %v1194_v1  ;;  %v841_v5 = vpack.c.bf16 %v129_v3, %v128_v2  ;;  %v216_v6 = vld [vmem:[#allocation8 + $0x8] sm:$0xff]  ;;  %v131_v8 = vld [vmem:[#allocation7 + $0x18] sm:$0xff]  ;;  %v217_v10 = vld [vmem:[#allocation8 + $0x10] sm:$0xff] }
  0x80   :  { %v865_v9 = vpack.c.bf16 %v216_v6, %v215_v4  ;;  %v218_v11 = vld [vmem:[#allocation8 + $0x18] sm:$0xff]  ;;  %v844_v12 = vpack.c.bf16 %v131_v8, %v130_v7  ;;  %v132_v14 = vld [vmem:[#allocation7 + $0x20] sm:$0xff]  ;;  %v133_v15 = vld [vmem:[#allocation7 + $0x28] sm:$0xff] }
  0x81   :  { %842 = vmatpush3.bf16.msra.mxu0 %v841_v5  ;;  %v868_v13 = vpack.c.bf16 %v218_v11, %v217_v10  ;;  %v219_v16 = vld [vmem:[#allocation8 + $0x20] sm:$0xff]  ;;  %v220_v17 = vld [vmem:[#allocation8 + $0x28] sm:$0xff]  ;;  %v847_v18 = vpack.c.bf16 %v133_v15, %v132_v14  ;;  %v134_v20 = vld [vmem:[#allocation7 + $0x30] sm:$0xff] }
  0x82   :  { %866 = vmatpush3.bf16.msra.mxu1 %v865_v9  ;;  %843 = vmatprep.subr.bf16.mxu0 %v1192_v0  ;;  %v871_v19 = vpack.c.bf16 %v220_v17, %v219_v16  ;;  %v135_v21 = vld [vmem:[#allocation7 + $0x38] sm:$0xff]  ;;  %v221_v22 = vld [vmem:[#allocation8 + $0x30] sm:$0xff]  ;;  %v136_v26 = vld [vmem:[#allocation7 + $0x40] sm:$0xff] }
  0x83   :  { %867 = vmatprep.subr.bf16.mxu1 %v1192_v0  ;;  %v222_v23 = vld [vmem:[#allocation8 + $0x38] sm:$0xff]  ;;  %v850_v24 = vpack.c.bf16 %v135_v21, %v134_v20  ;;  %v137_v27 = vld [vmem:[#allocation7 + $0x48] sm:$0xff]  ;;  %v223_v28 = vld [vmem:[#allocation8 + $0x40] sm:$0xff] }
  0x84   :  { %v874_v25 = vpack.c.bf16 %v222_v23, %v221_v22  ;;  %v224_v29 = vld [vmem:[#allocation8 + $0x48] sm:$0xff]  ;;  %v853_v30 = vpack.c.bf16 %v137_v27, %v136_v26  ;;  %v138_v32 = vld [vmem:[#allocation7 + $0x50] sm:$0xff]  ;;  %v139_v33 = vld [vmem:[#allocation7 + $0x58] sm:$0xff] }
  0x85   :  { %845 = vmatpush3.bf16.msra.mxu0 %v844_v12  ;;  %v877_v31 = vpack.c.bf16 %v224_v29, %v223_v28  ;;  %v225_v34 = vld [vmem:[#allocation8 + $0x50] sm:$0xff]  ;;  %v226_v35 = vld [vmem:[#allocation8 + $0x58] sm:$0xff]  ;;  %v856_v36 = vpack.c.bf16 %v139_v33, %v138_v32  ;;  %v140_v38 = vld [vmem:[#allocation7 + $0x60] sm:$0xff] }
  0x86   :  { %869 = vmatpush3.bf16.msra.mxu1 %v868_v13  ;;  %846 = vmatprep.subr.bf16.mxu0 %v1192_v0  ;;  %v880_v37 = vpack.c.bf16 %v226_v35, %v225_v34  ;;  %v141_v39 = vld [vmem:[#allocation7 + $0x68] sm:$0xff]  ;;  %v227_v40 = vld [vmem:[#allocation8 + $0x60] sm:$0xff]  ;;  %v142_v44 = vld [vmem:[#allocation7 + $0x70] sm:$0xff] }
  0x87   :  { %870 = vmatprep.subr.bf16.mxu1 %v1192_v0  ;;  %v228_v41 = vld [vmem:[#allocation8 + $0x68] sm:$0xff]  ;;  %v859_v42 = vpack.c.bf16 %v141_v39, %v140_v38  ;;  %v143_v45 = vld [vmem:[#allocation7 + $0x78] sm:$0xff]  ;;  %v229_v46 = vld [vmem:[#allocation8 + $0x70] sm:$0xff] }
  0x88   :  { %v883_v43 = vpack.c.bf16 %v228_v41, %v227_v40  ;;  %v230_v47 = vld [vmem:[#allocation8 + $0x78] sm:$0xff]  ;;  %v303_v48 = vld [vmem:[#allocation10 + $0x8] sm:$0xff]  ;;  %v862_v50 = vpack.c.bf16 %v143_v45, %v142_v44  ;;  %v302_v53 = vld [vmem:[#allocation10] sm:$0xff] }
  0x89   :  { %848 = vmatpush3.bf16.msra.mxu0 %v847_v18  ;;  %v305_v49 = vld [vmem:[#allocation10 + $0x18] sm:$0xff]  ;;  %v886_v51 = vpack.c.bf16 %v230_v47, %v229_v46  ;;  %v304_v54 = vld [vmem:[#allocation10 + $0x10] sm:$0xff]  ;;  %v307_v55 = vld [vmem:[#allocation10 + $0x28] sm:$0xff] }
  0x8a   :  { %872 = vmatpush3.bf16.msra.mxu1 %v871_v19  ;;  %849 = vmatprep.subr.bf16.mxu0 %v1192_v0  ;;  %v888_v52 = vpack.c.bf16 %v305_v49, %v303_v48  ;;  %v309_v56 = vld [vmem:[#allocation10 + $0x38] sm:$0xff]  ;;  %v127_v57 = vld [vmem:[#allocation2] sm:$0xff]  ;;  %v890_v58 = vpack.c.bf16 %v304_v54, %v302_v53  ;;  %v306_v61 = vld [vmem:[#allocation10 + $0x20] sm:$0xff] }
  0x8b   :  { %873 = vmatprep.subr.bf16.mxu1 %v1192_v0  ;;  %v214_v59 = vld [vmem:[#allocation5] sm:$0xff]  ;;  %v892_v60 = vpack.c.bf16 %v309_v56, %v307_v55  ;;  %v308_v62 = vld [vmem:[#allocation10 + $0x30] sm:$0xff]  ;;  %v311_v63 = vld [vmem:[#allocation10 + $0x48] sm:$0xff] }
  0x8c   :  { %v313_v2 = vld [vmem:[#allocation10 + $0x58] sm:$0xff]  ;;  %v894_v3 = vpack.c.bf16 %v308_v62, %v306_v61  ;;  %v310_v5 = vld [vmem:[#allocation10 + $0x40] sm:$0xff]  ;;  %v312_v6 = vld [vmem:[#allocation10 + $0x50] sm:$0xff] }
  0x8d   :  { %851 = vmatpush3.bf16.msra.mxu0 %v850_v24  ;;  %v896_v4 = vpack.c.bf16 %v313_v2, %v311_v63  ;;  %v315_v7 = vld [vmem:[#allocation10 + $0x68] sm:$0xff]  ;;  %v317_v8 = vld [vmem:[#allocation10 + $0x78] sm:$0xff]  ;;  %v898_v9 = vpack.c.bf16 %v312_v6, %v310_v5  ;;  %v314_v11 = vld [vmem:[#allocation10 + $0x60] sm:$0xff] }
  0x8e   :  { %875 = vmatpush3.bf16.msra.mxu1 %v874_v25  ;;  %852 = vmatprep.subr.bf16.mxu0 %v1192_v0  ;;  %v900_v10 = vpack.c.bf16 %v317_v8, %v315_v7  ;;  %v316_v12 = vld [vmem:[#allocation10 + $0x70] sm:$0xff]  ;;  %v319_v13 = vld [vmem:[#allocation10 + $0x88] sm:$0xff]  ;;  %v321_v14 = vld [vmem:[#allocation10 + $0x98] sm:$0xff] }
  0x8f   :  { %876 = vmatprep.subr.bf16.mxu1 %v1192_v0  ;;  %v902_v15 = vpack.c.bf16 %v316_v12, %v314_v11  ;;  %v904_v16 = vpack.c.bf16 %v321_v14, %v319_v13  ;;  %v318_v17 = vld [vmem:[#allocation10 + $0x80] sm:$0xff]  ;;  %v320_v18 = vld [vmem:[#allocation10 + $0x90] sm:$0xff]  ;;  %v323_v19 = vld [vmem:[#allocation10 + $0xa8] sm:$0xff] }
  0x90   :  { %v325_v20 = vld [vmem:[#allocation10 + $0xb8] sm:$0xff]  ;;  %v906_v21 = vpack.c.bf16 %v320_v18, %v318_v17  ;;  %v322_v23 = vld [vmem:[#allocation10 + $0xa0] sm:$0xff]  ;;  %v324_v24 = vld [vmem:[#allocation10 + $0xb0] sm:$0xff] }
  0x91   :  { %854 = vmatpush3.bf16.msra.mxu0 %v853_v30  ;;  %v908_v22 = vpack.c.bf16 %v325_v20, %v323_v19  ;;  %v327_v25 = vld [vmem:[#allocation10 + $0xc8] sm:$0xff]  ;;  %v329_v26 = vld [vmem:[#allocation10 + $0xd8] sm:$0xff]  ;;  %v910_v27 = vpack.c.bf16 %v324_v24, %v322_v23  ;;  %v326_v29 = vld [vmem:[#allocation10 + $0xc0] sm:$0xff] }
  0x92   :  { %878 = vmatpush3.bf16.msra.mxu1 %v877_v31  ;;  %855 = vmatprep.subr.bf16.mxu0 %v1192_v0  ;;  %v912_v28 = vpack.c.bf16 %v329_v26, %v327_v25  ;;  %v328_v30 = vld [vmem:[#allocation10 + $0xd0] sm:$0xff]  ;;  %v331_v31 = vld [vmem:[#allocation10 + $0xe8] sm:$0xff]  ;;  %v333_v32 = vld [vmem:[#allocation10 + $0xf8] sm:$0xff] }
  0x93   :  { %879 = vmatprep.subr.bf16.mxu1 %v1192_v0  ;;  %v914_v33 = vpack.c.bf16 %v328_v30, %v326_v29  ;;  %v916_v34 = vpack.c.bf16 %v333_v32, %v331_v31  ;;  %v330_v35 = vld [vmem:[#allocation10 + $0xe0] sm:$0xff]  ;;  %v436_v39 = vld [vmem:[#allocation11 + $0x88] sm:$0xff]  ;;  %v438_v44 = vld [vmem:[#allocation11 + $0x98] sm:$0xff] }
  0x94   :  { %v435_v38 = vld [vmem:[#allocation11 + $0x80] sm:$0xff]  ;;  %v421_v47 = vld [vmem:[#allocation11 + $0x10] sm:$0xff]  ;;  %v422_v48 = vld [vmem:[#allocation11 + $0x18] sm:$0xff] }
  0x95   :  { %857 = vmatpush3.bf16.msra.mxu0 %v856_v36  ;;  %v332_v36 = vld [vmem:[#allocation10 + $0xf0] sm:$0xff]  ;;  %v419_v40 = vld [vmem:[#allocation11] sm:$0xff]  ;;  %v920_v41 = vpack.c.bf16 %v436_v39, %v435_v38  ;;  %v424_v54 = vld [vmem:[#allocation11 + $0x28] sm:$0xff] }
  0x96   :  { %881 = vmatpush3.bf16.msra.mxu1 %v880_v37  ;;  %858 = vmatprep.subr.bf16.mxu0 %v1192_v0  ;;  %v918_v37 = vpack.c.bf16 %v332_v36, %v330_v35  ;;  %v439_v49 = vld [vmem:[#allocation11 + $0xa0] sm:$0xff]  ;;  %v441_v55 = vld [vmem:[#allocation11 + $0xb0] sm:$0xff]  ;;  %v442_v56 = vld [vmem:[#allocation11 + $0xb8] sm:$0xff] }
  0x97   :  { %882 = vmatprep.subr.bf16.mxu1 %v1192_v0  ;;  %v423_v53 = vld [vmem:[#allocation11 + $0x20] sm:$0xff]  ;;  %v444_v62 = vld [vmem:[#allocation11 + $0xc8] sm:$0xff]  ;;  %v445_v5 = vld [vmem:[#allocation11 + $0xd0] sm:$0xff] }
  0x98   :  { %v443_v61 = vld [vmem:[#allocation11 + $0xc0] sm:$0xff]  ;;  %v446_v6 = vld [vmem:[#allocation11 + $0xd8] sm:$0xff]  ;;  %v448_v12 = vld [vmem:[#allocation11 + $0xe8] sm:$0xff] }
  0x99   :  { %860 = vmatpush3.bf16.msra.mxu0 %v859_v42  ;;  %v420_v42 = vld [vmem:[#allocation11 + $0x8] sm:$0xff]  ;;  %v936_v2 = vpack.c.bf16 %v444_v62, %v443_v61  ;;  %v940_v8 = vpack.c.bf16 %v446_v6, %v445_v5  ;;  %v447_v11 = vld [vmem:[#allocation11 + $0xe0] sm:$0xff]  ;;  %v449_v23 = vld [vmem:[#allocation11 + $0xf0] sm:$0xff] }
  0x9a   :  { %884 = vmatpush3.bf16.msra.mxu1 %v883_v43  ;;  %861 = vmatprep.subr.bf16.mxu0 %v1192_v0  ;;  %v437_v43 = vld [vmem:[#allocation11 + $0x90] sm:$0xff]  ;;  %v922_v45 = vpack.c.bf16 %v420_v42, %v419_v40  ;;  %v944_v14 = vpack.c.bf16 %v448_v12, %v447_v11  ;;  %v431_v20 = vld [vmem:[#allocation11 + $0x60] sm:$0xff]  ;;  %v450_v24 = vld [vmem:[#allocation11 + $0xf8] sm:$0xff] }
  0x9b   :  { %885 = vmatprep.subr.bf16.mxu1 %v1192_v0  ;;  %v924_v46 = vpack.c.bf16 %v438_v44, %v437_v43  ;;  %v948_v25 = vpack.c.bf16 %v450_v24, %v449_v23  ;;  %v433_v26 = vld [vmem:[#allocation11 + $0x70] sm:$0xff]  ;;  %v529_v29 = vld [vmem:[#allocation13] sm:$0xff]  ;;  %v530_v30 = vld [vmem:[#allocation13 + $0x8] sm:$0xff] }
  0x9c   :  { %v531_v31 = vld [vmem:[#allocation13 + $0x10] sm:$0xff]  ;;  %v953_v32 = vpack.c.bf16 %v530_v30, %v529_v29  ;;  %v534_v35 = vld [vmem:[#allocation13 + $0x28] sm:$0xff]  ;;  %v536_v38 = vld [vmem:[#allocation13 + $0x38] sm:$0xff] }
  0x9d   :  { %863 = vmatpush3.bf16.msra.mxu0 %v862_v50  ;;  %v440_v50 = vld [vmem:[#allocation11 + $0xa8] sm:$0xff]  ;;  %v537_v40 = vld [vmem:[#allocation13 + $0x40] sm:$0xff]  ;;  %v539_v43 = vld [vmem:[#allocation13 + $0x50] sm:$0xff] }
  0x9e   :  { %887 = vmatpush3.bf16.msra.mxu1 %v886_v51  ;;  %889 = vmatprep.subr.bf16.mxu0 %v888_v52  ;;  %v926_v51 = vpack.c.bf16 %v422_v48, %v421_v47  ;;  %v928_v52 = vpack.c.bf16 %v440_v50, %v439_v49  ;;  %v540_v44 = vld [vmem:[#allocation13 + $0x58] sm:$0xff]  ;;  %v334_v49 = vld [vmem:[%s1404_s5] sm:$0x3] }
  0x9f   :  { %921 = vmatprep.subr.bf16.mxu1 %v920_v41  ;;  %v538_v41 = vld [vmem:[#allocation13 + $0x48] sm:$0xff]  ;;  %v543_v62 = vld [vmem:[#allocation13 + $0x70] sm:$0xff] }
  0xa0   :  { %768 = vmatmul.mubr.f32.vlgmr.msra.gmra.mrb[0].mxu0 %v127_v57  ;;  %v930_v57 = vpack.c.bf16 %v424_v54, %v423_v53  ;;  %v965_v42 = vpack.c.bf16 %v538_v41, %v537_v40 }
  0xa1   :  { %803 = vmatmul.mubr.f32.vlgmr.msra.gmra.mrb[0].mxu1 %v214_v59  ;;  %891 = vmatpush1.bf16.msra.mxu0 %v890_v58  ;;  %v932_v58 = vpack.c.bf16 %v442_v56, %v441_v55  ;;  %v425_v59 = vld [vmem:[#allocation11 + $0x30] sm:$0xff] }
  0xa2   :  { %893 = vmatprep.subr.bf16.mxu0 %v892_v60  ;;  %410 = vmatprep.mubr.f32.mxu0 %v1194_v1  ;;  %v426_v60 = vld [vmem:[#allocation11 + $0x38] sm:$0xff] }
  0xa3   :  { %923 = vmatpush3.bf16.msra.mxu1 %v922_v45  ;;  %v934_v63 = vpack.c.bf16 %v426_v60, %v425_v59  ;;  %v968_v45 = vpack.c.bf16 %v540_v44, %v539_v43  ;;  %v541_v59 = vld [vmem:[#allocation13 + $0x60] sm:$0xff]  ;;  %v542_v60 = vld [vmem:[#allocation13 + $0x68] sm:$0xff] }
  0xa4   :  { %925 = vmatprep.subr.bf16.mxu1 %v924_v46  ;;  %v336_v46 = vlaneseq  ;;  %v971_v61 = vpack.c.bf16 %v542_v60, %v541_v59 }
  0xa5   :  { %895 = vmatpush1.bf16.msra.mxu0 %v894_v3  ;;  %v427_v3 = vld [vmem:[#allocation11 + $0x40] sm:$0xff] }
  0xa6   :  { %897 = vmatprep.subr.bf16.mxu0 %v896_v4  ;;  %v428_v4 = vld [vmem:[#allocation11 + $0x48] sm:$0xff]  ;;  %v337_v47 = vshrl.u32 %v336_v46, 7 }
  0xa7   :  { %927 = vmatpush3.bf16.msra.mxu1 %v926_v51  ;;  %v938_v7 = vpack.c.bf16 %v428_v4, %v427_v3  ;;  %v647_v4 = vld [vmem:[%s1406_s7] ss:$0 sm:$0xff]  ;;  %s635_s7 = sshll.u32 %s1195_s18, 4  ;;  %s636_s7 = int_to_ptr.vmem [resolvable:$true] %s635_s7 }
  0xa8   :  { %929 = vmatprep.subr.bf16.mxu1 %v928_v52  ;;  %v338_v48 = vsub.s32 0, %v337_v47  ;;  %v342_v50 = vsub.s32 1, %v337_v47  ;;  %s1149_s19 = scalar_lea.vmem %s636_s7, 128  ;;  %p1154_p1 = scmp.lt.s32.totalorder %s636_s7, %s636_s7 }
  0xa9   :  { %899 = vmatpush1.bf16.msra.mxu0 %v898_v9  ;;  %v429_v9 = vld [vmem:[#allocation11 + $0x50] sm:$0xff]  ;;  %p1150_p0 = scmp.ne.s32.totalorder %s636_s7, %s1149_s19  ;;  %p1155_p2 = scmp.lt.s32.totalorder %s1149_s19, %s1149_s19 }
  0xaa   :  { %901 = vmatprep.subr.bf16.mxu0 %v900_v10  ;;  %v430_v10 = vld [vmem:[#allocation11 + $0x58] sm:$0xff]  ;;  %v339_v51 = vrot.slane %v334_v49, %v338_v48  ;;  %v343_v52 = vrot.slane %v334_v49, %v342_v50 }
  0xab   :  { %931 = vmatpush3.bf16.msra.mxu1 %v930_v57  ;;  %v942_v13 = vpack.c.bf16 %v430_v10, %v429_v9  ;;  %v648_v9 = vld [vmem:[%s1408_s9] ss:$0 sm:$0xff]  ;;  %p1156_p3 = por %p1155_p2, %p1154_p1 }
  0xac   :  { %933 = vmatprep.subr.bf16.mxu1 %v932_v58 }
  0xad   :  { %903 = vmatpush1.bf16.msra.mxu0 %v902_v15  ;;  %p1157_p4 = pnand %p1156_p3, %p1150_p0 }
  0xae   :  { %905 = vmatprep.subr.bf16.mxu0 %v904_v16 }
  0xaf   :  { %935 = vmatpush3.bf16.msra.mxu1 %v934_v63  ;;  %v544_v63 = vld [vmem:[#allocation13 + $0x78] sm:$0xff] }
  0xb0   :  { %937 = vmatprep.subr.bf16.mxu1 %v936_v2  ;;  %v974_v2 = vpack.c.bf16 %v544_v63, %v543_v62 }
  0xb1   :  { %907 = vmatpush1.bf16.msra.mxu0 %v906_v21  ;;  %v432_v21 = vld [vmem:[#allocation11 + $0x68] sm:$0xff] }
  0xb2   :  { %909 = vmatprep.subr.bf16.mxu0 %v908_v22  ;;  %v946_v22 = vpack.c.bf16 %v432_v21, %v431_v20 }
  0xb3   :  { %939 = vmatpush3.bf16.msra.mxu1 %v938_v7 }
  0xb4   :  { %941 = vmatprep.subr.bf16.mxu1 %v940_v8 }
  0xb5   :  { %911 = vmatpush1.bf16.msra.mxu0 %v910_v27  ;;  %v434_v27 = vld [vmem:[#allocation11 + $0x78] sm:$0xff] }
  0xb6   :  { %913 = vmatprep.subr.bf16.mxu0 %v912_v28  ;;  %v950_v28 = vpack.c.bf16 %v434_v27, %v433_v26 }
  0xb7   :  { %943 = vmatpush3.bf16.msra.mxu1 %v942_v13 }
  0xb8   :  { %945 = vmatprep.subr.bf16.mxu1 %v944_v14 }
  0xb9   :  { %915 = vmatpush1.bf16.msra.mxu0 %v914_v33  ;;  %v532_v33 = vld [vmem:[#allocation13 + $0x18] sm:$0xff] }
  0xba   :  { %917 = vmatprep.subr.bf16.mxu0 %v916_v34  ;;  %v956_v34 = vpack.c.bf16 %v532_v33, %v531_v31 }
  0xbb   :  { %947 = vmatpush3.bf16.msra.mxu1 %v946_v22 }
  0xbc   :  { %949 = vmatprep.subr.bf16.mxu1 %v948_v25 }
  0xbd   :  { %919 = vmatpush1.bf16.msra.mxu0 %v918_v37  ;;  %v535_v37 = vld [vmem:[#allocation13 + $0x30] sm:$0xff] }
  0xbe   :  { %952 = vmatprep.subr.bf16.mxu0 %v1192_v0  ;;  %v962_v39 = vpack.c.bf16 %v536_v38, %v535_v37 }
  0xbf   :  { %951 = vmatpush3.bf16.msra.mxu1 %v950_v28 }
 0x173   :  { %v210_v15 = vpop.f32.mrb[0].mxu0 }
 0x174   :  { %v297_v16 = vpop.f32.mrb[0].mxu1  ;;  %v769_v17 = vpop.f32.mrb[1].mxu0 }
 0x175   :  { %v301_v18 = vmul.f32 %v297_v16, %v210_v15  ;;  %v804_v19 = vpop.f32.mrb[1].mxu1 }
 0x177   :  { %411 = vmatmul.mubr.f32.vlgmr.msra.gmra.mrb[2].mxu0 %v301_v18 }
 0x178   :  { %837 = vmatprep.mubr.msk.f32.mxu0 %vm1193_vm0, %v1194_v1  ;;  %954 = vmatpush3.bf16.msra.mxu0 %v953_v32  ;;  %v533_v1 = vld [vmem:[#allocation13 + $0x20] sm:$0xff] }
 0x179   :  { %955 = vmatprep.subr.bf16.mxu0 %v1192_v0  ;;  %v959_v36 = vpack.c.bf16 %v534_v35, %v533_v1 }
 0x17c   :  { %957 = vmatpush3.bf16.msra.mxu0 %v956_v34 }
 0x17d   :  { %958 = vmatprep.subr.bf16.mxu0 %v1192_v0 }
 0x180   :  { %960 = vmatpush3.bf16.msra.mxu0 %v959_v36 }
 0x181   :  { %961 = vmatprep.subr.bf16.mxu0 %v1192_v0 }
 0x184   :  { %963 = vmatpush3.bf16.msra.mxu0 %v962_v39 }
 0x185   :  { %964 = vmatprep.subr.bf16.mxu0 %v1192_v0 }
 0x188   :  { %966 = vmatpush3.bf16.msra.mxu0 %v965_v42 }
 0x189   :  { %967 = vmatprep.subr.bf16.mxu0 %v1192_v0 }
 0x18c   :  { %969 = vmatpush3.bf16.msra.mxu0 %v968_v45 }
 0x18d   :  { %970 = vmatprep.subr.bf16.mxu0 %v1192_v0 }
 0x190   :  { %972 = vmatpush3.bf16.msra.mxu0 %v971_v61 }
 0x191   :  { %973 = vmatprep.subr.bf16.mxu0 %v1192_v0 }
 0x194   :  { %975 = vmatpush3.bf16.msra.mxu0 %v974_v2 }
 0x24a   :  { %v412_v53 = vpop.f32.mrb[2].mxu0 }
 0x24b   :  { %v413_v54 = vadd.f32 %v412_v53, %v339_v51  ;;  %v414_v55 = vpop.f32.mrb[3].mxu0 }
 0x24c   :  { %v415_v56 = vadd.f32 %v414_v55, %v343_v52 }
 0x24d   :  { %v417_v58 = vmax.f32 %v413_v54, 0.0 }
 0x24e   :  { %v418_v57 = vmax.f32 %v415_v56, 0.0 }
 0x250   :  { %522 = vmatprep.mubr.f32.mxu1 %v418_v57 }
 0x251   :  { %523 = vmatmul.mubr.f32.vlgmr.msra.gmra.mrb[2].mxu1 %v417_v58 }
 0x324   :  { %v715_v3 = vpop.f32.mrb[2].mxu1 }
 0x325   :  { %v716_v5 = vpop.f32.mrb[3].mxu1 }
 0x326   :  { %v717_v6 = vadd.f32 %v716_v5, %v715_v3 }
 0x328   :  { %v525_v7 = vadd.f32 %v717_v6, %v647_v4 }
 0x32a   :  { %v528_v8 = vmax.f32 %v525_v7, 0.0 }
 0x32c   :  { %838 = vmatmul.mubr.f32.vlgmr.msra.gmra.mrb[4].mxu0 %v528_v8 }
 0x3ff   :  { %v618_v10 = vpop.f32.mrb[4].mxu0 }
 0x400   :  { %v619_v0 = vadd.f32 %v648_v9, %v618_v10  ;;  %v839_v11 = vpop.f32.mrb[5].mxu0 }
 0x402   :  { %v622_v12 = vsub.f32 0.0, %v619_v0 }
 0x404   :  { %v623_v13 = vmul.f32 1.442695, %v622_v12 }
 0x406   :  { %991 = vpow2.f32 %v623_v13 }
 0x410   :  { %v992_v14 = vpop.eup %991 }
 0x411   :  { %v625_v15 = vadd.f32 1.0, %v992_v14 }
 0x413   :  { %993 = vrcp.f32 %v625_v15 }
 0x41d   :  { %v994_v16 = vpop.eup %993 }
 0x41e   :  { %628 = vst [vmem:[#allocation14] sm:$0xff] %v994_v16 }
 0x41f   :  { %1160 = shalt.err (!%p1157_p4)
}
 0x420   :  { %s1161_s21 = scalar_lea.hbm %s1409_s10, 128 }
 0x421   :  { %p1162_p5 = scmp.ne.s32.totalorder %s1409_s10, %s1161_s21  ;;  %p1165_p6 = scmp.lt.u32.totalorder %s1161_s21, %s1409_s10 }
 0x423   :  { %p1167_p7 = pnand %p1165_p6, %p1162_p5 }
 0x425   :  { %1170 = shalt.err (!%p1167_p7)
}
 0x426   :  { %638 = dma.vmem_to_hbm [thread:$0]  %s636_s7, 128, %s1409_s10, [#allocation4]  }
 0x427   :  { %1179 = dma.done.wait [#allocation4], 128  }
 0x428   :  { %1180 = vsyncadd [#allocation4], 4294967168 }
 0x429   :  { %642 = vsyncpa [#allocation3], 1 }
 0x42a   :  { %643 = vsyncpa [#allocation6], 1 }
 0x42b   :  { %644 = vsyncpa [#allocation9], 1 }
 0x42c   :  { %645 = vsyncpa [#allocation12], 1 }
 0x42d   :  { %646 = vsyncpa [#allocation4], 1 }

</bundles_post_ra>
